<compile_context>
chip_gen: v7x
topology: tpu7x:2x2x1
jax: 0.10.0
libtpu: 0.0.40
codegen_flags: <defaults>
</compile_context>

<pallas_src>
import functools

import jax
import jax.numpy as jnp
from jax import lax
from jax.experimental import pallas as pl
from jax.experimental.pallas import tpu as pltpu


def _round_up(x, m):
    return (x + m - 1) // m * m


def _focal_loss_kernel(x_ref, t_ref, *refs, gamma, ignore_index, n_rows, block_rows,
                       has_weight):
    if has_weight:
        w_ref, num_ref, den_ref = refs
    else:
        num_ref, den_ref = refs

    # Cast inside the kernel: the HBM->VMEM DMA moves the narrow model dtype.
    x = x_ref[...].astype(jnp.float32)            # (C, tn) logits, classes on sublanes
    tgt = t_ref[...]                              # (1, tn) int32 targets
    C, tn = x.shape

    # Numerically-stable softmax pieces over the class (sublane) axis.
    m = jnp.max(x, axis=0, keepdims=True)         # (1, tn)
    e = jnp.exp(x - m)                            # (C, tn)
    s = jnp.sum(e, axis=0, keepdims=True)         # (1, tn)

    cls = lax.broadcasted_iota(jnp.int32, (C, tn), 0)
    onehot = (cls == tgt).astype(jnp.float32)     # (C, tn); never hits ignore_index

    # Gather-first: only the target column of the modulated probs is ever used.
    e_t = jnp.sum(e * onehot, axis=0, keepdims=True)   # (1, tn) = e[i, target[i]]
    p_t = e_t / s                                       # softmax prob at target (exact divide)
    # Focal modulation exactly as the torch module writes it (pt = exp(prob), so 1-pt < 0).
    # NOTE: gamma must be a static Python int; a float gamma would be pow of a negative
    # base and yield NaN (same quirk as the PyTorch module).
    pt = jnp.exp(p_t)
    mod_t = (1.0 - pt) ** gamma * p_t                   # (1, tn)

    # Row validity: real target != ignore_index AND global row index < N
    # (the last block may overhang the array; no wrapper-side padding needed).
    col = pl.program_id(0) * block_rows + lax.broadcasted_iota(jnp.int32, (1, tn), 1)
    valid = jnp.logical_and(tgt != ignore_index, col < n_rows)

    if has_weight:
        w = w_ref[...].astype(jnp.float32)                    # (C, 1) class weights
        w_t = jnp.sum(w * onehot, axis=0, keepdims=True)      # (1, tn) weight[target[i]]
        num_c = jnp.where(valid, w_t * mod_t, 0.0)
        den_c = jnp.where(valid, w_t, 0.0)
    else:
        num_c = jnp.where(valid, mod_t, 0.0)
        den_c = valid.astype(jnp.float32)

    # Lane-dense per-block partials (unmasked 128-lane stores); reduced in the wrapper.
    num_ref[...] = jnp.broadcast_to(jnp.sum(num_c, axis=1, keepdims=True), num_ref.shape)
    den_ref[...] = jnp.broadcast_to(jnp.sum(den_c, axis=1, keepdims=True), den_ref.shape)


def focal_loss(output, target, gamma=2, weight=None, ignore_index=-100, block_rows=None):
    """output: [N, C] float (any dtype); target: [N] int; returns scalar f32 loss."""
    N, C = output.shape

    # (1 - exp(p)) is negative, so a non-integer gamma would NaN via pow (PyTorch quirk).
    if float(gamma) != int(gamma):
        raise ValueError("FocalLoss gamma must be an integer (non-integer gamma => NaN).")
    gamma = int(gamma)

    has_weight = weight is not None

    # Rows-on-lanes layout: classes on the sublane axis, rows on the 128-lane axis.
    # Single cheap N*C-byte copy in the wrapper; the kernel then runs fully lane-dense.
    xt = jnp.transpose(output, (1, 0))                  # (C, N), native dtype
    tgt2 = target.astype(jnp.int32).reshape(1, N)       # (1, N)

    # Tile size from a VMEM budget (f32 working set) and C, not a fixed row cap.
    # 2 MiB f32 per logits tile keeps the whole working set well under the scoped VMEM
    # defaults (16 MiB v5e / 32 MiB v6e,v7x) and v7x's 64 MiB physical VMEM.
    if block_rows is None:
        f32_budget = 2 * 1024 * 1024
        block_rows = max(128, (f32_budget // (C * 4)) // 128 * 128)
    block_rows = max(128, block_rows // 128 * 128)
    block_rows = min(block_rows, _round_up(N, 128))
    nb = pl.cdiv(N, block_rows)
    # TODO(synk): for very large C (vocab-sized class counts) block_rows=128 may still
    # exceed VMEM; a class-axis split with a carried row-max/sum would be needed there.

    in_specs = [
        pl.BlockSpec((C, block_rows), lambda i: (0, i)),   # logits tile, native dtype
        pl.BlockSpec((1, block_rows), lambda i: (0, i)),   # targets tile
    ]
    args = [xt, tgt2]
    if has_weight:
        w = jnp.asarray(weight, jnp.float32).reshape(C, 1)
        in_specs.append(pl.BlockSpec((C, 1), lambda i: (0, 0)))   # resident class weights
        args.append(w)

    kernel = functools.partial(_focal_loss_kernel, gamma=gamma, ignore_index=ignore_index,
                               n_rows=N, block_rows=block_rows, has_weight=has_weight)

    # Per-block partial (num, den) outputs -> the single grid axis is embarrassingly
    # parallel, so it can be sharded across the 2 TensorCores on v7x (no carried state).
    num_out, den_out = pl.pallas_call(
        kernel,
        out_shape=(jax.ShapeDtypeStruct((1, nb * 128), jnp.float32),
                   jax.ShapeDtypeStruct((1, nb * 128), jnp.float32)),
        grid_spec=pltpu.PrefetchScalarGridSpec(
            num_scalar_prefetch=0,
            grid=(nb,),
            in_specs=in_specs,
            out_specs=(pl.BlockSpec((1, 128), lambda i: (0, i)),
                       pl.BlockSpec((1, 128), lambda i: (0, i))),
        ),
        compiler_params=pltpu.CompilerParams(
            dimension_semantics=("parallel",),
            vmem_limit_bytes=32 * 1024 * 1024,   # fits v5e/v6e (128 MiB) and v7x (64 MiB)
        ),
    )(*args)

    num = jnp.sum(num_out.reshape(nb, 128)[:, 0])
    den = jnp.sum(den_out.reshape(nb, 128)[:, 0])
    # nll_loss(mean) = -sum(w_t * mod_t) / sum(w_t) over non-ignored rows.
    # (If every target is ignored this is 0/0 -> NaN, matching PyTorch.)
    return -(num / den)


def focal_loss_ref(output, target, gamma=2, weight=None, ignore_index=-100):
    """Pure-JAX reference with identical semantics (for sanity check)."""
    N, C = output.shape
    p = jax.nn.softmax(output.astype(jnp.float32), axis=1)
    pt = jnp.exp(p)
    mod = (1.0 - pt) ** gamma * p
    w = jnp.ones((C,), jnp.float32) if weight is None else jnp.asarray(weight, jnp.float32)
    valid = target != ignore_index
    tclip = jnp.where(valid, target, 0)
    gathered = mod[jnp.arange(N), tclip]
    wt = w[tclip]
    num = jnp.sum(jnp.where(valid, wt * gathered, 0.0))
    den = jnp.sum(jnp.where(valid, wt, 0.0))
    return -num / den


if __name__ == "__main__":
    key = jax.random.PRNGKey(0)
    k1, k2, k3, k4, k5, k6 = jax.random.split(key, 6)

    # --- Test 1: small f32 case (14 flattened tokens, 9 NER tag classes), no class weights.
    N, C = 14, 9
    logits = jax.random.normal(k1, (N, C), dtype=jnp.float32)
    targets = jax.random.randint(k2, (N,), 0, C, dtype=jnp.int32)
    targets = targets.at[3].set(-100).at[11].set(-100)   # padding tokens

    loss = jax.block_until_ready(focal_loss(logits, targets, gamma=2, ignore_index=-100))
    ref = focal_loss_ref(logits, targets, gamma=2, ignore_index=-100)
    assert jnp.allclose(loss, ref, rtol=1e-5, atol=1e-6), (loss, ref)

    # --- Test 2: bf16 ingress (native-dtype DMA, in-kernel cast) with class weights.
    N2, C2 = 50, 9
    logits2 = jax.random.normal(k3, (N2, C2), dtype=jnp.float32).astype(jnp.bfloat16)
    targets2 = jax.random.randint(k4, (N2,), 0, C2, dtype=jnp.int32)
    targets2 = targets2.at[0].set(-100).at[17].set(-100).at[49].set(-100)
    class_w = jnp.linspace(0.5, 1.5, C2, dtype=jnp.float32)

    loss2 = jax.block_until_ready(focal_loss(logits2, targets2, gamma=2, weight=class_w,
                                             ignore_index=-100))
    ref2 = focal_loss_ref(logits2.astype(jnp.float32), targets2, gamma=2,
                          weight=class_w, ignore_index=-100)
    assert jnp.allclose(loss2, ref2, rtol=1e-5, atol=1e-6), (loss2, ref2)

    # --- Test 3: multi-block grid with a ragged tail (exercises the in-kernel row mask
    #             and the per-block partial outputs across several "parallel" steps).
    N3, C3 = 300, 9
    logits3 = jax.random.normal(k5, (N3, C3), dtype=jnp.float32)
    targets3 = jax.random.randint(k6, (N3,), 0, C3, dtype=jnp.int32)
    targets3 = targets3.at[5].set(-100).at[255].set(-100).at[299].set(-100)

    loss3 = jax.block_until_ready(focal_loss(logits3, targets3, gamma=2, weight=class_w,
                                             ignore_index=-100, block_rows=128))
    ref3 = focal_loss_ref(logits3, targets3, gamma=2, weight=class_w, ignore_index=-100)
    assert jnp.allclose(loss3, ref3, rtol=1e-5, atol=1e-6), (loss3, ref3)

    print("KERNEL_OK")
</pallas_src>

<mosaic_0001>
module attributes {stable_mosaic.version = 11 : i64} {
  func.func @_focal_loss_kernel(%arg0: i32, %arg1: memref<9x128xf32, #tpu.memory_space<vmem>>, %arg2: memref<1x128xi32, #tpu.memory_space<vmem>>, %arg3: memref<1x128xf32, #tpu.memory_space<vmem>>, %arg4: memref<1x128xf32, #tpu.memory_space<vmem>>) attributes {dimension_semantics = [#tpu.dimension_semantics<parallel>], iteration_bounds = array<i64: 1>, scalar_prefetch = 0 : i64, scratch_operands = 0 : i64, tpu.core_type = #tpu.core_type<tc>, window_params = [{transform_indices = @transform_0, window_bounds = array<i64: 9, 128>}, {transform_indices = @transform_1, window_bounds = array<i64: 1, 128>}, {transform_indices = @transform_2, window_bounds = array<i64: 1, 128>}, {transform_indices = @transform_3, window_bounds = array<i64: 1, 128>}]} {
    %c0 = arith.constant 0 : index
    %c0_0 = arith.constant 0 : index
    %0 = vector.load %arg1[%c0, %c0_0] : memref<9x128xf32, #tpu.memory_space<vmem>>, vector<9x128xf32>
    %c0_1 = arith.constant 0 : index
    %c0_2 = arith.constant 0 : index
    %1 = vector.load %arg2[%c0_1, %c0_2] : memref<1x128xi32, #tpu.memory_space<vmem>>, vector<1x128xi32>
    %cst = arith.constant dense<0xFF800000> : vector<128xf32>
    %2 = vector.multi_reduction <maximumf>, %0, %cst [0] : vector<9x128xf32> to vector<128xf32>
    %3 = vector.shape_cast %2 : vector<128xf32> to vector<1x128xf32>
    %4 = vector.broadcast %3 : vector<1x128xf32> to vector<9x128xf32>
    %5 = arith.subf %0, %4 : vector<9x128xf32>
    %6 = math.exp %5 : vector<9x128xf32>
    %cst_3 = arith.constant dense<0.000000e+00> : vector<128xf32>
    %7 = vector.multi_reduction <add>, %6, %cst_3 [0] : vector<9x128xf32> to vector<128xf32>
    %8 = vector.shape_cast %7 : vector<128xf32> to vector<1x128xf32>
    %9 = tpu.iota {dimensions = array<i32: 0>} : vector<9x128xi32>
    %10 = vector.broadcast %1 : vector<1x128xi32> to vector<9x128xi32>
    %11 = arith.cmpi eq, %9, %10 : vector<9x128xi32>
    %12 = arith.extui %11 : vector<9x128xi1> to vector<9x128xi32>
    %13 = arith.sitofp %12 : vector<9x128xi32> to vector<9x128xf32>
    %14 = arith.mulf %6, %13 : vector<9x128xf32>
    %cst_4 = arith.constant dense<0.000000e+00> : vector<128xf32>
    %15 = vector.multi_reduction <add>, %14, %cst_4 [0] : vector<9x128xf32> to vector<128xf32>
    %16 = vector.shape_cast %15 : vector<128xf32> to vector<1x128xf32>
    %17 = arith.divf %16, %8 : vector<1x128xf32>
    %18 = math.exp %17 : vector<1x128xf32>
    %cst_5 = arith.constant 1.000000e+00 : f32
    %19 = vector.broadcast %cst_5 : f32 to vector<1x128xf32>
    %20 = arith.subf %19, %18 : vector<1x128xf32>
    %21 = arith.mulf %20, %20 : vector<1x128xf32>
    %22 = arith.mulf %21, %17 : vector<1x128xf32>
    %c128_i32 = arith.constant 128 : i32
    %23 = arith.muli %arg0, %c128_i32 : i32
    %24 = tpu.iota {dimensions = array<i32: 1>} : vector<1x128xi32>
    %25 = vector.broadcast %23 : i32 to vector<1x128xi32>
    %26 = arith.addi %25, %24 : vector<1x128xi32>
    %c-100_i32 = arith.constant -100 : i32
    %27 = vector.broadcast %c-100_i32 : i32 to vector<1x128xi32>
    %28 = arith.cmpi ne, %1, %27 : vector<1x128xi32>
    %c14_i32 = arith.constant 14 : i32
    %29 = vector.broadcast %c14_i32 : i32 to vector<1x128xi32>
    %30 = arith.cmpi slt, %26, %29 : vector<1x128xi32>
    %31 = arith.andi %28, %30 : vector<1x128xi1>
    %cst_6 = arith.constant 0.000000e+00 : f32
    %32 = vector.broadcast %cst_6 : f32 to vector<1x128xf32>
    %33 = arith.select %31, %22, %32 : vector<1x128xi1>, vector<1x128xf32>
    %34 = arith.extui %31 : vector<1x128xi1> to vector<1x128xi32>
    %35 = arith.sitofp %34 : vector<1x128xi32> to vector<1x128xf32>
    %cst_7 = arith.constant dense<0.000000e+00> : vector<1xf32>
    %36 = vector.multi_reduction <add>, %33, %cst_7 [1] : vector<1x128xf32> to vector<1xf32>
    %37 = vector.shape_cast %36 : vector<1xf32> to vector<1x1xf32>
    %38 = vector.shape_cast %37 : vector<1x1xf32> to vector<1x1xf32>
    %39 = vector.broadcast %38 : vector<1x1xf32> to vector<1x128xf32>
    %c0_8 = arith.constant 0 : index
    %c0_9 = arith.constant 0 : index
    %40 = vector.load %arg3[%c0_8, %c0_9] : memref<1x128xf32, #tpu.memory_space<vmem>>, vector<1x128xf32>
    tpu.vector_store %arg3[%c0_8, %c0_9], %39 {strides = array<i32>} : memref<1x128xf32, #tpu.memory_space<vmem>>, vector<1x128xf32>,
    %cst_10 = arith.constant dense<0.000000e+00> : vector<1xf32>
    %41 = vector.multi_reduction <add>, %35, %cst_10 [1] : vector<1x128xf32> to vector<1xf32>
    %42 = vector.shape_cast %41 : vector<1xf32> to vector<1x1xf32>
    %43 = vector.shape_cast %42 : vector<1x1xf32> to vector<1x1xf32>
    %44 = vector.broadcast %43 : vector<1x1xf32> to vector<1x128xf32>
    %c0_11 = arith.constant 0 : index
    %c0_12 = arith.constant 0 : index
    %45 = vector.load %arg4[%c0_11, %c0_12] : memref<1x128xf32, #tpu.memory_space<vmem>>, vector<1x128xf32>
    tpu.vector_store %arg4[%c0_11, %c0_12], %44 {strides = array<i32>} : memref<1x128xf32, #tpu.memory_space<vmem>>, vector<1x128xf32>,
    return
  }
  func.func @transform_0(%arg0: i32) -> (i32, i32) {
    %c0_i32 = arith.constant 0 : i32
    %c0_i32_0 = arith.constant 0 : i32
    return %c0_i32, %arg0 : i32, i32
  }
  func.func @transform_1(%arg0: i32) -> (i32, i32) {
    %c0_i32 = arith.constant 0 : i32
    %c0_i32_0 = arith.constant 0 : i32
    return %c0_i32, %arg0 : i32, i32
  }
  func.func @transform_2(%arg0: i32) -> (i32, i32) {
    %c0_i32 = arith.constant 0 : i32
    %c0_i32_0 = arith.constant 0 : i32
    return %c0_i32, %arg0 : i32, i32
  }
  func.func @transform_3(%arg0: i32) -> (i32, i32) {
    %c0_i32 = arith.constant 0 : i32
    %c0_i32_0 = arith.constant 0 : i32
    return %c0_i32, %arg0 : i32, i32
  }
}

</mosaic_0001>

<bundles_post_ra>
// kernel: tpu_custom_call.1
= control target key start
LH: loop header
LB: loop body
LE: loop exit
PB: predicated region body
PF: predicated region fallthrough
CT: control target
= control target key end

     0   :  { %9 = vsyncpa [#allocation3], 0  ;;  %s292_s0 = inlined_call_operand.hbm [shape: f32[9,14], index: 0, kind: input, shape index: {}]   ;;  %s293_s1 = inlined_call_operand.vmem [shape: s32[1,14], index: 1, kind: input, shape index: {}]   ;;  %s294_s2 = inlined_call_operand.hbm [shape: f32[1,128], index: 2, kind: output, shape index: {0}]   ;;  %s295_s3 = inlined_call_operand.hbm [shape: f32[1,128], index: 3, kind: output, shape index: {1}]  }
   0x1   :  { %10 = vsyncpa [#allocation4], 0 }
   0x2   :  { %11 = vsyncpa [#allocation7], 0  ;;  %s222_s12 = smov [#allocation2]   ;;  %s150_s16 = scalar_lea.hbm %s292_s0, 256 }
   0x3   :  { %s17_s13 = sshll.u32 %s222_s12, 4  ;;  %p151_p0 = scmp.ne.s32.totalorder %s292_s0, %s150_s16  ;;  %s18_s13 = int_to_ptr.vmem [resolvable:$true] %s17_s13 }
   0x4   :  { %p154_p1 = scmp.lt.u32.totalorder %s150_s16, %s292_s0 }
   0x6   :  { %p156_p2 = pnand %p154_p1, %p151_p0 }
   0x8   :  { %159 = shalt.err (!%p156_p2)
}
   0x9   :  { %s160_s21 = scalar_lea.vmem %s18_s13, 256  ;;  %p165_p4 = scmp.lt.s32.totalorder %s18_s13, %s18_s13 }
   0xa   :  { %p161_p3 = scmp.ne.s32.totalorder %s18_s13, %s160_s21  ;;  %p166_p5 = scmp.lt.s32.totalorder %s160_s21, %s160_s21 }
   0xc   :  { %p167_p6 = por %p166_p5, %p165_p4 }
   0xe   :  { %p168_p7 = pnand %p167_p6, %p161_p3 }
  0x10   :  { %171 = shalt.err (!%p168_p7)
}
  0x11   :  { %s223_s22 = smov 128   ;;  %s224_s23 = smov 8  }
  0x12   :  { %23 = dma.hbm_to_vmem [thread:$0]  %s292_s0, 256, %s18_s13, [#allocation3], %s223_s22, %s223_s22, %s224_s23  }
  0x13   :  { %216 = dma.done.wait [#allocation3], 256  }
  0x14   :  { %217 = vsyncadd [#allocation3], 4294967040  ;;  %vm32_vm0 = vcmask 1040384   ;;  %v29_v0 = vld [vmem:[#allocation2] sm:$0xff]  ;;  %v30_v1 = vld [vmem:[#allocation2 + $0x8] sm:$0x1]  ;;  %v55_v7 = vlaneseq }
  0x15   :  { %v33_v2 = vsel %vm32_vm0, %v30_v1, -inf  ;;  %v31_v15 = vld [vmem:[%s293_s1] sm:$0x1]  ;;  %v225_v20 = vmov 0.0   ;;  %s226_s1 = smov [#allocation5]   ;;  %s227_s28 = smov [#allocation6]  }
  0x16   :  { %v34_v3 = vmax.f32 %v29_v0, %v33_v2  ;;  %v56_v10 = vshrl.u32 %v55_v7, 7  ;;  %v87_v46 = vand.u32 127, %v55_v7  ;;  %vm90_vm3 = vcmp.ne.s32.totalorder %v31_v15, 4294967196  ;;  %s110_s27 = sshll.u32 %s226_s1, 4  ;;  %s120_s29 = sshll.u32 %s227_s28, 4  ;;  %s111_s27 = int_to_ptr.vmem [resolvable:$true] %s110_s27  ;;  %s121_s29 = int_to_ptr.vmem [resolvable:$true] %s120_s29 }
  0x17   :  { %s172_s30 = scalar_lea.vmem %s111_s27, 16  ;;  %s176_s4 = scalar_lea.vmem %s111_s27, 32 }
  0x18   :  { %v35_v4 = vrot.slane %v34_v3, 4  ;;  %v60_v14 = vsub.s32 0, %v56_v10  ;;  %v57_v19 = vadd.s32 8, %v56_v10  ;;  %vm91_vm4 = vcmp.lt.s32.totalorder %v87_v46, 14  ;;  %p173_p8 = scmp.ne.s32.totalorder %s111_s27, %s172_s30  ;;  %p177_p9 = scmp.lt.s32.totalorder %s111_s27, %s111_s27 }
  0x19   :  { %vm92_vm5 = vmand %vm90_vm3, %vm91_vm4  ;;  %p178_p10 = scmp.lt.s32.totalorder %s176_s4, %s172_s30 }
  0x1a   :  { %v36_v5 = vmax.f32 %v34_v3, %v35_v4  ;;  %v61_v18 = vrot.slane %v31_v15, %v60_v14  ;;  %v135_v52 = vsel %vm92_vm5, 1.0, %v225_v20 }
  0x1b   :  { %v100_v54 = vsel %vm32_vm0, %v135_v52, 0.0  ;;  %p179_p11 = por %p178_p10, %p177_p9 }
  0x1c   :  { %v37_v6 = vrot.slane %v36_v5, 2  ;;  %vm62_vm1 = vcmp.eq.s32.totalorder %v56_v10, %v61_v18  ;;  %vm63_vm2 = vcmp.eq.s32.totalorder %v57_v19, %v61_v18 }
  0x1d   :  { %v133_v21 = vsel %vm62_vm1, 1.0, %v225_v20  ;;  %v134_v22 = vsel %vm63_vm2, 1.0, %v225_v20  ;;  %p180_p12 = pnand %p179_p11, %p173_p8 }
  0x1e   :  { %v38_v8 = vmax.f32 %v36_v5, %v37_v6 }
  0x20   :  { %v39_v9 = vrot.slane %v38_v8, 1 }
  0x22   :  { %v40_v11 = vmax.f32 %v38_v8, %v39_v9 }
  0x24   :  { %v41_v12 = vsub.f32 %v29_v0, %v40_v11  ;;  %v42_v13 = vsub.f32 %v30_v1, %v40_v11 }
  0x26   :  { %v43_v16 = vmul.f32 1.442695, %v41_v12  ;;  %v45_v17 = vmul.f32 1.442695, %v42_v13 }
  0x28   :  { %142 = vpow2.f32 %v43_v16 }
  0x29   :  { %144 = vpow2.f32 %v45_v17 }
  0x32   :  { %v143_v23 = vpop.eup %142 }
  0x33   :  { %v145_v24 = vpop.eup %144  ;;  %v68_v25 = vmul.f32 %v143_v23, %v133_v21 }
  0x34   :  { %v47_v26 = vsel %vm32_vm0, %v145_v24, 0.0  ;;  %v69_v27 = vmul.f32 %v145_v24, %v134_v22 }
  0x35   :  { %v48_v28 = vadd.f32 %v143_v23, %v47_v26 }
  0x36   :  { %v70_v29 = vsel %vm32_vm0, %v69_v27, 0.0 }
  0x37   :  { %v49_v30 = vrot.slane %v48_v28, 4  ;;  %v71_v31 = vadd.f32 %v70_v29, %v68_v25 }
  0x39   :  { %v50_v32 = vadd.f32 %v49_v30, %v48_v28  ;;  %v72_v33 = vrot.slane %v71_v31, 4 }
  0x3b   :  { %v51_v34 = vrot.slane %v50_v32, 2  ;;  %v73_v35 = vadd.f32 %v72_v33, %v71_v31 }
  0x3d   :  { %v52_v36 = vadd.f32 %v51_v34, %v50_v32  ;;  %v74_v37 = vrot.slane %v73_v35, 2 }
  0x3f   :  { %v53_v38 = vrot.slane %v52_v36, 1  ;;  %v75_v40 = vadd.f32 %v74_v37, %v73_v35 }
  0x41   :  { %v54_v39 = vadd.f32 %v53_v38, %v52_v36  ;;  %v76_v41 = vrot.slane %v75_v40, 1 }
  0x43   :  { %146 = vrcp.f32 %v54_v39  ;;  %v77_v42 = vadd.f32 %v76_v41, %v75_v40 }
  0x4d   :  { %v147_v43 = vpop.eup %146 }
  0x4e   :  { %v79_v44 = vmul.f32 %v147_v43, %v77_v42 }
  0x50   :  { %v80_v45 = vmul.f32 1.442695, %v79_v44 }
  0x52   :  { %148 = vpow2.f32 %v80_v45 }
  0x5c   :  { %v149_v47 = vpop.eup %148 }
  0x5d   :  { %v82_v48 = vsub.f32 1.0, %v149_v47 }
  0x5f   :  { %v83_v49 = vmul.f32 %v82_v48, %v82_v48 }
  0x61   :  { %v84_v50 = vmul.f32 %v83_v49, %v79_v44 }
  0x63   :  { %v93_v51 = vsel %vm92_vm5, %v84_v50, 0.0 }
  0x64   :  { %v96_v53 = vsel %vm32_vm0, %v93_v51, 0.0 }
  0x65   :  { %97 = vadd.xlane.f32.xlu0 %v96_v53 }
  0x69   :  { %101 = vadd.xlane.f32.xlu0 %v100_v54 }
  0xf2   :  { %v98_v55 = vpop.xlane.xlu0 %97 }
  0xf3   :  { %99 = vst [vmem:[#allocation5] sm:$0x1] %v98_v55 }
  0xf4   :  { %183 = shalt.err (!%p180_p12)
}
  0xf5   :  { %s184_s7 = scalar_lea.hbm %s294_s2, 16 }
  0xf6   :  { %p185_p13 = scmp.ne.s32.totalorder %s294_s2, %s184_s7  ;;  %p188_p0 = scmp.lt.u32.totalorder %s184_s7, %s294_s2 }
  0xf8   :  { %p190_p1 = pnand %p188_p0, %p185_p13 }
  0xfa   :  { %193 = shalt.err (!%p190_p1)
}
  0xfb   :  { %113 = dma.vmem_to_hbm [thread:$0]  %s111_s27, 16, %s294_s2, [#allocation4]   ;;  %v102_v56 = vpop.xlane.xlu0 %101 }
  0xfc   :  { %103 = vst [vmem:[#allocation6] sm:$0x1] %v102_v56  ;;  %s194_s14 = scalar_lea.vmem %s121_s29, 16  ;;  %s198_s15 = scalar_lea.vmem %s121_s29, 32 }
  0xfd   :  { %p195_p2 = scmp.ne.s32.totalorder %s121_s29, %s194_s14  ;;  %p199_p3 = scmp.lt.s32.totalorder %s121_s29, %s121_s29 }
  0xfe   :  { %p200_p4 = scmp.lt.s32.totalorder %s198_s15, %s194_s14 }
 0x100   :  { %p201_p5 = por %p200_p4, %p199_p3 }
 0x102   :  { %p202_p6 = pnand %p201_p5, %p195_p2 }
 0x104   :  { %205 = shalt.err (!%p202_p6)
}
 0x105   :  { %s206_s18 = scalar_lea.hbm %s295_s3, 16 }
 0x106   :  { %p207_p7 = scmp.ne.s32.totalorder %s295_s3, %s206_s18  ;;  %p210_p8 = scmp.lt.u32.totalorder %s206_s18, %s295_s3 }
 0x108   :  { %p212_p9 = pnand %p210_p8, %p207_p7 }
 0x10a   :  { %215 = shalt.err (!%p212_p9)
}
 0x10b   :  { %123 = dma.vmem_to_hbm [thread:$0]  %s121_s29, 16, %s295_s3, [#allocation7]  }
 0x10c   :  { %218 = dma.done.wait [#allocation4], 16  }
 0x10d   :  { %219 = vsyncadd [#allocation4], 4294967280 }
 0x10e   :  { %220 = dma.done.wait [#allocation7], 16  }
 0x10f   :  { %221 = vsyncadd [#allocation7], 4294967280 }
 0x110   :  { %130 = vsyncpa [#allocation3], 1 }
 0x111   :  { %131 = vsyncpa [#allocation4], 1 }
 0x112   :  { %132 = vsyncpa [#allocation7], 1 }

</bundles_post_ra>
